<compile_context>
chip_gen: v7x
topology: tpu7x:2x2x1
jax: 0.10.0
libtpu: 0.0.40
codegen_flags: <defaults>
</compile_context>

<pallas_src>
import math

import numpy as np
import jax
import jax.numpy as jnp
from jax.experimental import pallas as pl
from jax.experimental.pallas import tpu as pltpu


def _pick_t_tile(T, cap):
    """Largest frame tile <= cap that divides T and is sublane friendly."""
    if T <= cap:
        return T
    for d in range(cap, 7, -1):
        if d % 8 == 0 and T % d == 0:
            return d
    return T  # fall back to a single tile


def _vmem_limit_bytes(T_TILE, dim, n_fft, hop, R):
    """Derive the scoped-VMEM limit from actual buffer math (+ headroom)."""
    rows_t = T_TILE + R - 1
    blk = (T_TILE * dim * 2              # x tile (bf16)
           + dim * (n_fft + 2) * 2       # fused Linear weight (bf16)
           + (n_fft + 2) * 4             # bias (f32)
           + n_fft * n_fft * 2           # stacked [C; S] basis (bf16)
           + n_fft * 4                   # nyquist basis row (f32)
           + rows_t * hop * 4)           # output tile (f32)
    interm = T_TILE * (n_fft + 2) * 4 * 8  # h/mag/cos/sin/re/im/reim/frames
    est = int(2 * blk + 1.5 * interm) + (4 << 20)
    return max(16 << 20, min(est, 48 << 20))


def istft_constants(n_fft, hop, T):
    """Stacked windowed real-DFT basis, Nyquist row, and 1/OLA-envelope."""
    F_bulk = n_fft // 2
    R = n_fft // hop
    rows = T + R - 1
    out_len = rows * hop                      # == (T - 1) * hop + n_fft

    k = np.arange(F_bulk, dtype=np.float64)[:, None]
    n = np.arange(n_fft, dtype=np.float64)[None, :]
    ang = 2.0 * np.pi * k * n / n_fft
    wgt = np.where(k == 0, 1.0, 2.0) / n_fft
    # torch.hann_window default (periodic=True), folded into the bases.
    window = 0.5 * (1.0 - np.cos(2.0 * np.pi * np.arange(n_fft) / n_fft))

    # Stacked basis: rows [0, F_bulk) are the cos part, rows [F_bulk, 2*F_bulk)
    # the -sin part, so one dot([re | im], CS) reproduces irfft * window.
    CS = np.concatenate([(wgt * np.cos(ang)) * window[None, :],
                         (-wgt * np.sin(ang)) * window[None, :]],
                        axis=0).astype(np.float32)
    # Nyquist bin: appears once -> weight 1/n_fft (NOT 2/n_fft); sin(pi*n)=0.
    c_nyq = ((1.0 / n_fft) * np.cos(np.pi * np.arange(n_fft)) * window)
    c_nyq = c_nyq[None, :].astype(np.float32)

    env = np.zeros((out_len,), np.float64)
    w2 = window ** 2
    for t in range(T):
        env[t * hop:t * hop + n_fft] += w2
    inv_env = np.where(env > 1e-11, 1.0 / np.maximum(env, 1e-30), 0.0)
    inv_env = inv_env.reshape(rows, hop).astype(np.float32)

    return (jnp.asarray(CS, jnp.bfloat16), jnp.asarray(c_nyq, jnp.float32),
            jnp.asarray(inv_env, jnp.float32))


def make_istft_head_call(B, NT, T_TILE, dim, n_fft, hop, single_buffer_consts):
    R = n_fft // hop
    F_bulk = n_fft // 2
    rows_t = T_TILE + R - 1

    def kernel(x_ref, w_ref, b_ref, cs_ref, nyq_ref, o_ref):
        # Fused Linear head -> [logabs_bulk | arg_bulk | logabs_N | arg_N].
        # Bias stays a broadcast add to keep the contraction K == dim aligned.
        h = (jnp.dot(x_ref[...], w_ref[...], preferred_element_type=jnp.float32)
             + b_ref[...])                                   # (T_TILE, n_fft+2) f32

        logabs = h[:, :F_bulk]
        arg = h[:, F_bulk:2 * F_bulk]
        mag = jnp.minimum(jnp.exp(logabs), 100.0)
        mag = jnp.where(mag < 0.01, 0.0, mag)
        re = (mag * jnp.cos(arg)).astype(jnp.bfloat16)       # (T_TILE, F_bulk)
        im = (mag * jnp.sin(arg)).astype(jnp.bfloat16)

        # Nyquist bin peeled out as a rank-1 VPU update (sin term vanishes).
        mag_n = jnp.minimum(jnp.exp(h[:, 2 * F_bulk:2 * F_bulk + 1]), 100.0)
        mag_n = jnp.where(mag_n < 0.01, 0.0, mag_n)
        re_n = mag_n * jnp.cos(h[:, 2 * F_bulk + 1:])        # (T_TILE, 1) f32

        # Single fused irfft*window matmul over K = 2*F_bulk (MXU-aligned).
        reim = jnp.concatenate([re, im], axis=1)             # (T_TILE, 2*F_bulk)
        frames = jnp.dot(reim, cs_ref[...], preferred_element_type=jnp.float32)
        frames = frames + re_n * nyq_ref[...]                # (T_TILE, n_fft) f32

        # Vectorized overlap-add straight into the output block: assign r=0,
        # zero only the R-1 trailing halo rows, then R-1 shifted adds.
        o_ref[:T_TILE, :] = frames[:, :hop]
        if R > 1:
            o_ref[T_TILE:, :] = jnp.zeros((R - 1, hop), jnp.float32)
            for r in range(1, R):
                o_ref[r:r + T_TILE, :] += frames[:, r * hop:(r + 1) * hop]

    const_kw = {}
    if single_buffer_consts:
        # Grid-invariant inputs: second pipeline buffer is pure VMEM waste.
        const_kw = dict(pipeline_mode=pl.Buffered(buffer_count=1))

    def const_spec(shape):
        return pl.BlockSpec(shape, lambda b, t: (0,) * len(shape), **const_kw)

    grid_spec = pltpu.PrefetchScalarGridSpec(
        num_scalar_prefetch=0,
        grid=(B, NT),
        in_specs=[
            pl.BlockSpec((None, T_TILE, dim), lambda b, t: (b, t, 0)),  # x bf16
            const_spec((dim, n_fft + 2)),        # reordered Linear weight bf16
            const_spec((1, n_fft + 2)),          # reordered bias f32
            const_spec((2 * F_bulk, n_fft)),     # stacked windowed [C; S] bf16
            const_spec((1, n_fft)),              # windowed Nyquist row f32
        ],
        out_specs=pl.BlockSpec((None, None, rows_t, hop),
                               lambda b, t: (b, t, 0, 0)),
    )

    flops = int(B * NT * (2 * T_TILE * dim * (n_fft + 2)
                          + 2 * T_TILE * (2 * F_bulk) * n_fft
                          + 4 * T_TILE * n_fft))
    transcendentals = int(B * NT * T_TILE * (3 * F_bulk + 2))
    bytes_accessed = int(B * NT * T_TILE * dim * 2
                         + dim * (n_fft + 2) * 2 + (n_fft + 2) * 4
                         + 2 * F_bulk * n_fft * 2 + n_fft * 4
                         + B * NT * rows_t * hop * 4)

    return pl.pallas_call(
        kernel,
        out_shape=jax.ShapeDtypeStruct((B, NT, rows_t, hop), jnp.float32),
        grid_spec=grid_spec,
        compiler_params=pltpu.CompilerParams(
            dimension_semantics=("parallel", "parallel"),
            vmem_limit_bytes=_vmem_limit_bytes(T_TILE, dim, n_fft, hop, R),
        ),
        cost_estimate=pl.CostEstimate(flops=flops,
                                      transcendentals=transcendentals,
                                      bytes_accessed=bytes_accessed),
    )


def istft_head_forward(x, W, bias, n_fft, hop, t_tile_cap=256):
    """x: (B, Frame, Feat) f32; W: (dim, n_fft+2); bias: (n_fft+2,) -> (B, T*hop)."""
    B, T, dim = x.shape
    F = n_fft // 2 + 1
    assert n_fft % hop == 0, "vectorized OLA assumes hop divides n_fft"
    assert (n_fft - hop) % 2 == 0, "'same' padding assumes even (n_fft - hop)"
    R = n_fft // hop
    F_bulk = n_fft // 2
    rows = T + R - 1
    pad = (n_fft - hop) // 2

    T_TILE = _pick_t_tile(T, t_tile_cap)
    NT = T // T_TILE
    rows_t = T_TILE + R - 1

    CS, c_nyq, inv_env = istft_constants(n_fft, hop, T)

    # Reorder Linear columns to [mag_bulk | phase_bulk | mag_N | phase_N]: the
    # in-kernel splits land on the F_bulk boundary (128-aligned in production)
    # and no zero padding of the frequency axis is needed anymore.
    W_cat = jnp.concatenate([W[:, :F_bulk], W[:, F:F + F_bulk],
                             W[:, F_bulk:F], W[:, F + F_bulk:]],
                            axis=1).astype(jnp.bfloat16)
    b_cat = jnp.concatenate([bias[:F_bulk], bias[F:F + F_bulk],
                             bias[F_bulk:F], bias[F + F_bulk:]])
    b_cat = b_cat[None, :].astype(jnp.float32)
    x_bf16 = x.astype(jnp.bfloat16)

    try:
        call = make_istft_head_call(B, NT, T_TILE, dim, n_fft, hop,
                                    single_buffer_consts=True)
        parts = call(x_bf16, W_cat, b_cat, CS, c_nyq)       # (B, NT, rows_t, hop)
    except Exception:
        # Fallback if this JAX build rejects pipeline_mode=pl.Buffered(1).
        call = make_istft_head_call(B, NT, T_TILE, dim, n_fft, hop,
                                    single_buffer_consts=False)
        parts = call(x_bf16, W_cat, b_cat, CS, c_nyq)

    # Halo-sum adjacent frame tiles (tiny XLA adds; overlap is only R-1 rows),
    # then envelope-normalize and trim the 'same' padding.
    if NT == 1:
        full = parts[:, 0]
    else:
        full = jnp.zeros((B, rows, hop), jnp.float32)
        for i in range(NT):
            full = full.at[:, i * T_TILE:i * T_TILE + rows_t].add(parts[:, i])
    wave = (full * inv_env[None]).reshape(B, rows * hop)
    return wave[:, pad:pad + T * hop]


def istft_head_ref(x, W, bias, n_fft, hop):
    """Pure-JAX reference matching the PyTorch forward (padding='same')."""
    B, T, dim = x.shape
    F = n_fft // 2 + 1
    out_len = (T - 1) * hop + n_fft
    pad = (n_fft - hop) // 2

    h = jnp.einsum("btd,dk->btk", x, W) + bias           # Linear
    h = jnp.transpose(h, (0, 2, 1))                      # (B, n_fft+2, Frame)
    logabs, arg = h[:, :F], h[:, F:]
    mag = jnp.minimum(jnp.exp(logabs), 100.0)
    mag = jnp.where(mag < 0.01, 0.0, mag)
    spec = mag * (jnp.cos(arg) + 1j * jnp.sin(arg))      # (B, F, Frame)

    ifft = jnp.fft.irfft(spec, n=n_fft, axis=1)          # (B, n_fft, Frame)
    window = 0.5 * (1.0 - jnp.cos(2.0 * math.pi * jnp.arange(n_fft) / n_fft))
    ifft = ifft * window[None, :, None]

    y = jnp.zeros((B, out_len), jnp.float32)
    env = jnp.zeros((out_len,), jnp.float32)
    for t in range(T):
        y = y.at[:, t * hop:t * hop + n_fft].add(ifft[:, :, t])
        env = env.at[t * hop:t * hop + n_fft].add(window ** 2)
    return y[:, pad:out_len - pad] / env[pad:out_len - pad]


if __name__ == "__main__":
    key = jax.random.PRNGKey(0)

    def run_case(B, T, dim, n_fft, hop, t_tile_cap):
        kx, kw, kb = jax.random.split(jax.random.fold_in(key, T), 3)
        # Deterministic synthetic parameters (nn.Linear(dim, n_fft+2), weight
        # kept in (in, out) layout as parameter-setup glue).
        x = jax.random.normal(kx, (B, T, dim), jnp.float32)
        W = jax.random.normal(kw, (dim, n_fft + 2), jnp.float32) / math.sqrt(dim)
        bias = jax.random.normal(kb, (n_fft + 2,), jnp.float32) * 0.02

        wave = istft_head_forward(x, W, bias, n_fft, hop, t_tile_cap=t_tile_cap)
        jax.block_until_ready(wave)

        ref = istft_head_ref(x, W, bias, n_fft, hop)
        wave_np, ref_np = np.asarray(wave), np.asarray(ref)
        # Loose elementwise check (bf16 MXU operands by design) ...
        np.testing.assert_allclose(wave_np, ref_np, rtol=1e-1, atol=1e-1)
        # ... plus an SNR-style relative-L2 check so bf16 phase error is not
        # silently masked (review correctness concern).
        rel = np.linalg.norm(wave_np - ref_np) / max(np.linalg.norm(ref_np), 1e-12)
        assert rel < 5e-2, f"relative L2 error too high: {rel}"

    # Small shapes consistent with the module: Frame=8/32, Feat=32, n_fft=16.
    run_case(B=2, T=8, dim=32, n_fft=16, hop=4, t_tile_cap=256)   # single tile
    run_case(B=2, T=32, dim=32, n_fft=16, hop=4, t_tile_cap=16)   # tiled + halo sum
    print("KERNEL_OK")
</pallas_src>

<mosaic_0001>
module attributes {stable_mosaic.version = 11 : i64} {
  func.func @kernel(%arg0: i32, %arg1: i32, %arg2: memref<1x8x32xbf16, #tpu.memory_space<vmem>>, %arg3: memref<32x18xbf16, #tpu.memory_space<vmem>>, %arg4: memref<1x18xf32, #tpu.memory_space<vmem>>, %arg5: memref<16x16xbf16, #tpu.memory_space<vmem>>, %arg6: memref<1x16xf32, #tpu.memory_space<vmem>>, %arg7: memref<1x1x11x4xf32, #tpu.memory_space<vmem>>) attributes {dimension_semantics = [#tpu.dimension_semantics<parallel>, #tpu.dimension_semantics<parallel>], iteration_bounds = array<i64: 2, 1>, scalar_prefetch = 0 : i64, scratch_operands = 0 : i64, tpu.core_type = #tpu.core_type<tc>, window_params = [{transform_indices = @transform_0, window_bounds = array<i64: 1, 8, 32>}, {pipeline_mode = #tpu.pipeline_mode<synchronous>, transform_indices = @transform_1, window_bounds = array<i64: 32, 18>}, {pipeline_mode = #tpu.pipeline_mode<synchronous>, transform_indices = @transform_2, window_bounds = array<i64: 1, 18>}, {pipeline_mode = #tpu.pipeline_mode<synchronous>, transform_indices = @transform_3, window_bounds = array<i64: 16, 16>}, {pipeline_mode = #tpu.pipeline_mode<synchronous>, transform_indices = @transform_4, window_bounds = array<i64: 1, 16>}, {transform_indices = @transform_5, window_bounds = array<i64: 1, 1, 11, 4>}]} {
    %c0 = arith.constant 0 : index
    %c0_0 = arith.constant 0 : index
    %c0_1 = arith.constant 0 : index
    %0 = vector.load %arg2[%c0, %c0_0, %c0_1] : memref<1x8x32xbf16, #tpu.memory_space<vmem>>, vector<1x8x32xbf16>
    %1 = vector.shape_cast %0 : vector<1x8x32xbf16> to vector<8x32xbf16>
    %c0_2 = arith.constant 0 : index
    %c0_3 = arith.constant 0 : index
    %2 = vector.load %arg3[%c0_2, %c0_3] : memref<32x18xbf16, #tpu.memory_space<vmem>>, vector<32x18xbf16>
    %cst = arith.constant dense<0.000000e+00> : vector<8x18xf32>
    %3 = tpu.matmul %1, %2, %cst {dimension_numbers = #tpu.dot_dimension_numbers<[1], [0], [0], [1], [0, 0, 1, 1], [], []>} : vector<8x32xbf16>, vector<32x18xbf16>, vector<8x18xf32> -> vector<8x18xf32>
    %c0_4 = arith.constant 0 : index
    %c0_5 = arith.constant 0 : index
    %4 = vector.load %arg4[%c0_4, %c0_5] : memref<1x18xf32, #tpu.memory_space<vmem>>, vector<1x18xf32>
    %5 = vector.broadcast %4 : vector<1x18xf32> to vector<8x18xf32>
    %6 = arith.addf %3, %5 : vector<8x18xf32>
    %7 = vector.extract_strided_slice %6 {offsets = [0, 0], sizes = [8, 8], strides = [1, 1]} : vector<8x18xf32> to vector<8x8xf32>
    %8 = vector.extract_strided_slice %6 {offsets = [0, 8], sizes = [8, 8], strides = [1, 1]} : vector<8x18xf32> to vector<8x8xf32>
    %9 = math.exp %7 : vector<8x8xf32>
    %cst_6 = arith.constant 1.000000e+02 : f32
    %10 = vector.broadcast %cst_6 : f32 to vector<8x8xf32>
    %11 = arith.minimumf %9, %10 : vector<8x8xf32>
    %cst_7 = arith.constant 0.00999999977 : f32
    %12 = vector.broadcast %cst_7 : f32 to vector<8x8xf32>
    %13 = arith.cmpf olt, %11, %12 : vector<8x8xf32>
    %cst_8 = arith.constant 0.000000e+00 : f32
    %14 = vector.broadcast %cst_8 : f32 to vector<8x8xf32>
    %15 = arith.select %13, %14, %11 : vector<8x8xi1>, vector<8x8xf32>
    %16 = math.cos %8 : vector<8x8xf32>
    %17 = arith.mulf %15, %16 : vector<8x8xf32>
    %18 = arith.truncf %17 : vector<8x8xf32> to vector<8x8xbf16>
    %19 = math.sin %8 : vector<8x8xf32>
    %20 = arith.mulf %15, %19 : vector<8x8xf32>
    %21 = arith.truncf %20 : vector<8x8xf32> to vector<8x8xbf16>
    %22 = vector.extract_strided_slice %6 {offsets = [0, 16], sizes = [8, 1], strides = [1, 1]} : vector<8x18xf32> to vector<8x1xf32>
    %23 = math.exp %22 : vector<8x1xf32>
    %cst_9 = arith.constant 1.000000e+02 : f32
    %24 = vector.broadcast %cst_9 : f32 to vector<8x1xf32>
    %25 = arith.minimumf %23, %24 : vector<8x1xf32>
    %cst_10 = arith.constant 0.00999999977 : f32
    %26 = vector.broadcast %cst_10 : f32 to vector<8x1xf32>
    %27 = arith.cmpf olt, %25, %26 : vector<8x1xf32>
    %cst_11 = arith.constant 0.000000e+00 : f32
    %28 = vector.broadcast %cst_11 : f32 to vector<8x1xf32>
    %29 = arith.select %27, %28, %25 : vector<8x1xi1>, vector<8x1xf32>
    %30 = vector.extract_strided_slice %6 {offsets = [0, 17], sizes = [8, 1], strides = [1, 1]} : vector<8x18xf32> to vector<8x1xf32>
    %31 = math.cos %30 : vector<8x1xf32>
    %32 = arith.mulf %29, %31 : vector<8x1xf32>
    %33 = tpu.concatenate %18, %21 in 1 : vector<8x8xbf16>, vector<8x8xbf16> -> vector<8x16xbf16>
    %c0_12 = arith.constant 0 : index
    %c0_13 = arith.constant 0 : index
    %34 = vector.load %arg5[%c0_12, %c0_13] : memref<16x16xbf16, #tpu.memory_space<vmem>>, vector<16x16xbf16>
    %cst_14 = arith.constant dense<0.000000e+00> : vector<8x16xf32>
    %35 = tpu.matmul %33, %34, %cst_14 {dimension_numbers = #tpu.dot_dimension_numbers<[1], [0], [0], [1], [0, 0, 1, 1], [], []>} : vector<8x16xbf16>, vector<16x16xbf16>, vector<8x16xf32> -> vector<8x16xf32>
    %c0_15 = arith.constant 0 : index
    %c0_16 = arith.constant 0 : index
    %36 = vector.load %arg6[%c0_15, %c0_16] : memref<1x16xf32, #tpu.memory_space<vmem>>, vector<1x16xf32>
    %37 = vector.broadcast %32 : vector<8x1xf32> to vector<8x16xf32>
    %38 = vector.broadcast %36 : vector<1x16xf32> to vector<8x16xf32>
    %39 = arith.mulf %37, %38 : vector<8x16xf32>
    %40 = arith.addf %35, %39 : vector<8x16xf32>
    %41 = vector.extract_strided_slice %40 {offsets = [0, 0], sizes = [8, 4], strides = [1, 1]} : vector<8x16xf32> to vector<8x4xf32>
    %c0_17 = arith.constant 0 : index
    %c0_18 = arith.constant 0 : index
    %c0_19 = arith.constant 0 : index
    %c0_20 = arith.constant 0 : index
    %42 = vector.load %arg7[%c0_17, %c0_18, %c0_19, %c0_20] : memref<1x1x11x4xf32, #tpu.memory_space<vmem>>, vector<1x1x8x4xf32>
    %43 = vector.shape_cast %42 : vector<1x1x8x4xf32> to vector<8x4xf32>
    %44 = vector.shape_cast %41 : vector<8x4xf32> to vector<1x1x8x4xf32>
    tpu.vector_store %arg7[%c0_17, %c0_18, %c0_19, %c0_20], %44 {strides = array<i32>} : memref<1x1x11x4xf32, #tpu.memory_space<vmem>>, vector<1x1x8x4xf32>,
    %cst_21 = arith.constant 0.000000e+00 : f32
    %45 = vector.broadcast %cst_21 : f32 to vector<3x4xf32>
    %c0_22 = arith.constant 0 : index
    %c0_23 = arith.constant 0 : index
    %c8 = arith.constant 8 : index
    %c0_24 = arith.constant 0 : index
    %46 = vector.load %arg7[%c0_22, %c0_23, %c8, %c0_24] : memref<1x1x11x4xf32, #tpu.memory_space<vmem>>, vector<1x1x3x4xf32>
    %47 = vector.shape_cast %46 : vector<1x1x3x4xf32> to vector<3x4xf32>
    %48 = vector.shape_cast %45 : vector<3x4xf32> to vector<1x1x3x4xf32>
    tpu.vector_store %arg7[%c0_22, %c0_23, %c8, %c0_24], %48 {strides = array<i32>} : memref<1x1x11x4xf32, #tpu.memory_space<vmem>>, vector<1x1x3x4xf32>,
    %c0_25 = arith.constant 0 : index
    %c0_26 = arith.constant 0 : index
    %c1 = arith.constant 1 : index
    %c0_27 = arith.constant 0 : index
    %49 = vector.load %arg7[%c0_25, %c0_26, %c1, %c0_27] : memref<1x1x11x4xf32, #tpu.memory_space<vmem>>, vector<1x1x8x4xf32>
    %50 = vector.shape_cast %49 : vector<1x1x8x4xf32> to vector<8x4xf32>
    %51 = vector.extract_strided_slice %40 {offsets = [0, 4], sizes = [8, 4], strides = [1, 1]} : vector<8x16xf32> to vector<8x4xf32>
    %52 = arith.addf %50, %51 : vector<8x4xf32>
    %c0_28 = arith.constant 0 : index
    %c0_29 = arith.constant 0 : index
    %c1_30 = arith.constant 1 : index
    %c0_31 = arith.constant 0 : index
    %53 = vector.load %arg7[%c0_28, %c0_29, %c1_30, %c0_31] : memref<1x1x11x4xf32, #tpu.memory_space<vmem>>, vector<1x1x8x4xf32>
    %54 = vector.shape_cast %53 : vector<1x1x8x4xf32> to vector<8x4xf32>
    %55 = vector.shape_cast %52 : vector<8x4xf32> to vector<1x1x8x4xf32>
    tpu.vector_store %arg7[%c0_28, %c0_29, %c1_30, %c0_31], %55 {strides = array<i32>} : memref<1x1x11x4xf32, #tpu.memory_space<vmem>>, vector<1x1x8x4xf32>,
    %c0_32 = arith.constant 0 : index
    %c0_33 = arith.constant 0 : index
    %c2 = arith.constant 2 : index
    %c0_34 = arith.constant 0 : index
    %56 = vector.load %arg7[%c0_32, %c0_33, %c2, %c0_34] : memref<1x1x11x4xf32, #tpu.memory_space<vmem>>, vector<1x1x8x4xf32>
    %57 = vector.shape_cast %56 : vector<1x1x8x4xf32> to vector<8x4xf32>
    %58 = vector.extract_strided_slice %40 {offsets = [0, 8], sizes = [8, 4], strides = [1, 1]} : vector<8x16xf32> to vector<8x4xf32>
    %59 = arith.addf %57, %58 : vector<8x4xf32>
    %c0_35 = arith.constant 0 : index
    %c0_36 = arith.constant 0 : index
    %c2_37 = arith.constant 2 : index
    %c0_38 = arith.constant 0 : index
    %60 = vector.load %arg7[%c0_35, %c0_36, %c2_37, %c0_38] : memref<1x1x11x4xf32, #tpu.memory_space<vmem>>, vector<1x1x8x4xf32>
    %61 = vector.shape_cast %60 : vector<1x1x8x4xf32> to vector<8x4xf32>
    %62 = vector.shape_cast %59 : vector<8x4xf32> to vector<1x1x8x4xf32>
    tpu.vector_store %arg7[%c0_35, %c0_36, %c2_37, %c0_38], %62 {strides = array<i32>} : memref<1x1x11x4xf32, #tpu.memory_space<vmem>>, vector<1x1x8x4xf32>,
    %c0_39 = arith.constant 0 : index
    %c0_40 = arith.constant 0 : index
    %c3 = arith.constant 3 : index
    %c0_41 = arith.constant 0 : index
    %63 = vector.load %arg7[%c0_39, %c0_40, %c3, %c0_41] : memref<1x1x11x4xf32, #tpu.memory_space<vmem>>, vector<1x1x8x4xf32>
    %64 = vector.shape_cast %63 : vector<1x1x8x4xf32> to vector<8x4xf32>
    %65 = vector.extract_strided_slice %40 {offsets = [0, 12], sizes = [8, 4], strides = [1, 1]} : vector<8x16xf32> to vector<8x4xf32>
    %66 = arith.addf %64, %65 : vector<8x4xf32>
    %c0_42 = arith.constant 0 : index
    %c0_43 = arith.constant 0 : index
    %c3_44 = arith.constant 3 : index
    %c0_45 = arith.constant 0 : index
    %67 = vector.load %arg7[%c0_42, %c0_43, %c3_44, %c0_45] : memref<1x1x11x4xf32, #tpu.memory_space<vmem>>, vector<1x1x8x4xf32>
    %68 = vector.shape_cast %67 : vector<1x1x8x4xf32> to vector<8x4xf32>
    %69 = vector.shape_cast %66 : vector<8x4xf32> to vector<1x1x8x4xf32>
    tpu.vector_store %arg7[%c0_42, %c0_43, %c3_44, %c0_45], %69 {strides = array<i32>} : memref<1x1x11x4xf32, #tpu.memory_space<vmem>>, vector<1x1x8x4xf32>,
    return
  }
  func.func @transform_0(%arg0: i32, %arg1: i32) -> (i32, i32, i32) {
    %c0_i32 = arith.constant 0 : i32
    %c0_i32_0 = arith.constant 0 : i32
    return %arg0, %arg1, %c0_i32 : i32, i32, i32
  }
  func.func @transform_1(%arg0: i32, %arg1: i32) -> (i32, i32) {
    %c0_i32 = arith.constant 0 : i32
    %c0_i32_0 = arith.constant 0 : i32
    %c0_i32_1 = arith.constant 0 : i32
    return %c0_i32, %c0_i32_0 : i32, i32
  }
  func.func @transform_2(%arg0: i32, %arg1: i32) -> (i32, i32) {
    %c0_i32 = arith.constant 0 : i32
    %c0_i32_0 = arith.constant 0 : i32
    %c0_i32_1 = arith.constant 0 : i32
    return %c0_i32, %c0_i32_0 : i32, i32
  }
  func.func @transform_3(%arg0: i32, %arg1: i32) -> (i32, i32) {
    %c0_i32 = arith.constant 0 : i32
    %c0_i32_0 = arith.constant 0 : i32
    %c0_i32_1 = arith.constant 0 : i32
    return %c0_i32, %c0_i32_0 : i32, i32
  }
  func.func @transform_4(%arg0: i32, %arg1: i32) -> (i32, i32) {
    %c0_i32 = arith.constant 0 : i32
    %c0_i32_0 = arith.constant 0 : i32
    %c0_i32_1 = arith.constant 0 : i32
    return %c0_i32, %c0_i32_0 : i32, i32
  }
  func.func @transform_5(%arg0: i32, %arg1: i32) -> (i32, i32, i32, i32) {
    %c0_i32 = arith.constant 0 : i32
    %c0_i32_0 = arith.constant 0 : i32
    %c0_i32_1 = arith.constant 0 : i32
    return %arg0, %arg1, %c0_i32, %c0_i32_0 : i32, i32, i32, i32
  }
}

module attributes {stable_mosaic.version = 11 : i64} {
  func.func @kernel(%arg0: i32, %arg1: i32, %arg2: memref<1x8x32xbf16, #tpu.memory_space<vmem>>, %arg3: memref<32x18xbf16, #tpu.memory_space<vmem>>, %arg4: memref<1x18xf32, #tpu.memory_space<vmem>>, %arg5: memref<16x16xbf16, #tpu.memory_space<vmem>>, %arg6: memref<1x16xf32, #tpu.memory_space<vmem>>, %arg7: memref<1x1x11x4xf32, #tpu.memory_space<vmem>>) attributes {dimension_semantics = [#tpu.dimension_semantics<parallel>, #tpu.dimension_semantics<parallel>], iteration_bounds = array<i64: 2, 1>, scalar_prefetch = 0 : i64, scratch_operands = 0 : i64, tpu.core_type = #tpu.core_type<tc>, window_params = [{transform_indices = @transform_0, window_bounds = array<i64: 1, 8, 32>}, {pipeline_mode = #tpu.pipeline_mode<synchronous>, transform_indices = @transform_1, window_bounds = array<i64: 32, 18>}, {pipeline_mode = #tpu.pipeline_mode<synchronous>, transform_indices = @transform_2, window_bounds = array<i64: 1, 18>}, {pipeline_mode = #tpu.pipeline_mode<synchronous>, transform_indices = @transform_3, window_bounds = array<i64: 16, 16>}, {pipeline_mode = #tpu.pipeline_mode<synchronous>, transform_indices = @transform_4, window_bounds = array<i64: 1, 16>}, {transform_indices = @transform_5, window_bounds = array<i64: 1, 1, 11, 4>}]} {
    %c0 = arith.constant 0 : index
    %c0_0 = arith.constant 0 : index
    %c0_1 = arith.constant 0 : index
    %0 = vector.load %arg2[%c0, %c0_0, %c0_1] : memref<1x8x32xbf16, #tpu.memory_space<vmem>>, vector<1x8x32xbf16>
    %1 = vector.shape_cast %0 : vector<1x8x32xbf16> to vector<8x32xbf16>
    %c0_2 = arith.constant 0 : index
    %c0_3 = arith.constant 0 : index
    %2 = vector.load %arg3[%c0_2, %c0_3] : memref<32x18xbf16, #tpu.memory_space<vmem>>, vector<32x18xbf16>
    %cst = arith.constant dense<0.000000e+00> : vector<8x18xf32>
    %3 = tpu.matmul %1, %2, %cst {dimension_numbers = #tpu.dot_dimension_numbers<[1], [0], [0], [1], [0, 0, 1, 1], [], []>} : vector<8x32xbf16>, vector<32x18xbf16>, vector<8x18xf32> -> vector<8x18xf32>
    %c0_4 = arith.constant 0 : index
    %c0_5 = arith.constant 0 : index
    %4 = vector.load %arg4[%c0_4, %c0_5] : memref<1x18xf32, #tpu.memory_space<vmem>>, vector<1x18xf32>
    %5 = vector.broadcast %4 : vector<1x18xf32> to vector<8x18xf32>
    %6 = arith.addf %3, %5 : vector<8x18xf32>
    %7 = vector.extract_strided_slice %6 {offsets = [0, 0], sizes = [8, 8], strides = [1, 1]} : vector<8x18xf32> to vector<8x8xf32>
    %8 = vector.extract_strided_slice %6 {offsets = [0, 8], sizes = [8, 8], strides = [1, 1]} : vector<8x18xf32> to vector<8x8xf32>
    %9 = math.exp %7 : vector<8x8xf32>
    %cst_6 = arith.constant 1.000000e+02 : f32
    %10 = vector.broadcast %cst_6 : f32 to vector<8x8xf32>
    %11 = arith.minimumf %9, %10 : vector<8x8xf32>
    %cst_7 = arith.constant 0.00999999977 : f32
    %12 = vector.broadcast %cst_7 : f32 to vector<8x8xf32>
    %13 = arith.cmpf olt, %11, %12 : vector<8x8xf32>
    %cst_8 = arith.constant 0.000000e+00 : f32
    %14 = vector.broadcast %cst_8 : f32 to vector<8x8xf32>
    %15 = arith.select %13, %14, %11 : vector<8x8xi1>, vector<8x8xf32>
    %16 = math.cos %8 : vector<8x8xf32>
    %17 = arith.mulf %15, %16 : vector<8x8xf32>
    %18 = arith.truncf %17 : vector<8x8xf32> to vector<8x8xbf16>
    %19 = math.sin %8 : vector<8x8xf32>
    %20 = arith.mulf %15, %19 : vector<8x8xf32>
    %21 = arith.truncf %20 : vector<8x8xf32> to vector<8x8xbf16>
    %22 = vector.extract_strided_slice %6 {offsets = [0, 16], sizes = [8, 1], strides = [1, 1]} : vector<8x18xf32> to vector<8x1xf32>
    %23 = math.exp %22 : vector<8x1xf32>
    %cst_9 = arith.constant 1.000000e+02 : f32
    %24 = vector.broadcast %cst_9 : f32 to vector<8x1xf32>
    %25 = arith.minimumf %23, %24 : vector<8x1xf32>
    %cst_10 = arith.constant 0.00999999977 : f32
    %26 = vector.broadcast %cst_10 : f32 to vector<8x1xf32>
    %27 = arith.cmpf olt, %25, %26 : vector<8x1xf32>
    %cst_11 = arith.constant 0.000000e+00 : f32
    %28 = vector.broadcast %cst_11 : f32 to vector<8x1xf32>
    %29 = arith.select %27, %28, %25 : vector<8x1xi1>, vector<8x1xf32>
    %30 = vector.extract_strided_slice %6 {offsets = [0, 17], sizes = [8, 1], strides = [1, 1]} : vector<8x18xf32> to vector<8x1xf32>
    %31 = math.cos %30 : vector<8x1xf32>
    %32 = arith.mulf %29, %31 : vector<8x1xf32>
    %33 = tpu.concatenate %18, %21 in 1 : vector<8x8xbf16>, vector<8x8xbf16> -> vector<8x16xbf16>
    %c0_12 = arith.constant 0 : index
    %c0_13 = arith.constant 0 : index
    %34 = vector.load %arg5[%c0_12, %c0_13] : memref<16x16xbf16, #tpu.memory_space<vmem>>, vector<16x16xbf16>
    %cst_14 = arith.constant dense<0.000000e+00> : vector<8x16xf32>
    %35 = tpu.matmul %33, %34, %cst_14 {dimension_numbers = #tpu.dot_dimension_numbers<[1], [0], [0], [1], [0, 0, 1, 1], [], []>} : vector<8x16xbf16>, vector<16x16xbf16>, vector<8x16xf32> -> vector<8x16xf32>
    %c0_15 = arith.constant 0 : index
    %c0_16 = arith.constant 0 : index
    %36 = vector.load %arg6[%c0_15, %c0_16] : memref<1x16xf32, #tpu.memory_space<vmem>>, vector<1x16xf32>
    %37 = vector.broadcast %32 : vector<8x1xf32> to vector<8x16xf32>
    %38 = vector.broadcast %36 : vector<1x16xf32> to vector<8x16xf32>
    %39 = arith.mulf %37, %38 : vector<8x16xf32>
    %40 = arith.addf %35, %39 : vector<8x16xf32>
    %41 = vector.extract_strided_slice %40 {offsets = [0, 0], sizes = [8, 4], strides = [1, 1]} : vector<8x16xf32> to vector<8x4xf32>
    %c0_17 = arith.constant 0 : index
    %c0_18 = arith.constant 0 : index
    %c0_19 = arith.constant 0 : index
    %c0_20 = arith.constant 0 : index
    %42 = vector.load %arg7[%c0_17, %c0_18, %c0_19, %c0_20] : memref<1x1x11x4xf32, #tpu.memory_space<vmem>>, vector<1x1x8x4xf32>
    %43 = vector.shape_cast %42 : vector<1x1x8x4xf32> to vector<8x4xf32>
    %44 = vector.shape_cast %41 : vector<8x4xf32> to vector<1x1x8x4xf32>
    tpu.vector_store %arg7[%c0_17, %c0_18, %c0_19, %c0_20], %44 {strides = array<i32>} : memref<1x1x11x4xf32, #tpu.memory_space<vmem>>, vector<1x1x8x4xf32>,
    %cst_21 = arith.constant 0.000000e+00 : f32
    %45 = vector.broadcast %cst_21 : f32 to vector<3x4xf32>
    %c0_22 = arith.constant 0 : index
    %c0_23 = arith.constant 0 : index
    %c8 = arith.constant 8 : index
    %c0_24 = arith.constant 0 : index
    %46 = vector.load %arg7[%c0_22, %c0_23, %c8, %c0_24] : memref<1x1x11x4xf32, #tpu.memory_space<vmem>>, vector<1x1x3x4xf32>
    %47 = vector.shape_cast %46 : vector<1x1x3x4xf32> to vector<3x4xf32>
    %48 = vector.shape_cast %45 : vector<3x4xf32> to vector<1x1x3x4xf32>
    tpu.vector_store %arg7[%c0_22, %c0_23, %c8, %c0_24], %48 {strides = array<i32>} : memref<1x1x11x4xf32, #tpu.memory_space<vmem>>, vector<1x1x3x4xf32>,
    %c0_25 = arith.constant 0 : index
    %c0_26 = arith.constant 0 : index
    %c1 = arith.constant 1 : index
    %c0_27 = arith.constant 0 : index
    %49 = vector.load %arg7[%c0_25, %c0_26, %c1, %c0_27] : memref<1x1x11x4xf32, #tpu.memory_space<vmem>>, vector<1x1x8x4xf32>
    %50 = vector.shape_cast %49 : vector<1x1x8x4xf32> to vector<8x4xf32>
    %51 = vector.extract_strided_slice %40 {offsets = [0, 4], sizes = [8, 4], strides = [1, 1]} : vector<8x16xf32> to vector<8x4xf32>
    %52 = arith.addf %50, %51 : vector<8x4xf32>
    %c0_28 = arith.constant 0 : index
    %c0_29 = arith.constant 0 : index
    %c1_30 = arith.constant 1 : index
    %c0_31 = arith.constant 0 : index
    %53 = vector.load %arg7[%c0_28, %c0_29, %c1_30, %c0_31] : memref<1x1x11x4xf32, #tpu.memory_space<vmem>>, vector<1x1x8x4xf32>
    %54 = vector.shape_cast %53 : vector<1x1x8x4xf32> to vector<8x4xf32>
    %55 = vector.shape_cast %52 : vector<8x4xf32> to vector<1x1x8x4xf32>
    tpu.vector_store %arg7[%c0_28, %c0_29, %c1_30, %c0_31], %55 {strides = array<i32>} : memref<1x1x11x4xf32, #tpu.memory_space<vmem>>, vector<1x1x8x4xf32>,
    %c0_32 = arith.constant 0 : index
    %c0_33 = arith.constant 0 : index
    %c2 = arith.constant 2 : index
    %c0_34 = arith.constant 0 : index
    %56 = vector.load %arg7[%c0_32, %c0_33, %c2, %c0_34] : memref<1x1x11x4xf32, #tpu.memory_space<vmem>>, vector<1x1x8x4xf32>
    %57 = vector.shape_cast %56 : vector<1x1x8x4xf32> to vector<8x4xf32>
    %58 = vector.extract_strided_slice %40 {offsets = [0, 8], sizes = [8, 4], strides = [1, 1]} : vector<8x16xf32> to vector<8x4xf32>
    %59 = arith.addf %57, %58 : vector<8x4xf32>
    %c0_35 = arith.constant 0 : index
    %c0_36 = arith.constant 0 : index
    %c2_37 = arith.constant 2 : index
    %c0_38 = arith.constant 0 : index
    %60 = vector.load %arg7[%c0_35, %c0_36, %c2_37, %c0_38] : memref<1x1x11x4xf32, #tpu.memory_space<vmem>>, vector<1x1x8x4xf32>
    %61 = vector.shape_cast %60 : vector<1x1x8x4xf32> to vector<8x4xf32>
    %62 = vector.shape_cast %59 : vector<8x4xf32> to vector<1x1x8x4xf32>
    tpu.vector_store %arg7[%c0_35, %c0_36, %c2_37, %c0_38], %62 {strides = array<i32>} : memref<1x1x11x4xf32, #tpu.memory_space<vmem>>, vector<1x1x8x4xf32>,
    %c0_39 = arith.constant 0 : index
    %c0_40 = arith.constant 0 : index
    %c3 = arith.constant 3 : index
    %c0_41 = arith.constant 0 : index
    %63 = vector.load %arg7[%c0_39, %c0_40, %c3, %c0_41] : memref<1x1x11x4xf32, #tpu.memory_space<vmem>>, vector<1x1x8x4xf32>
    %64 = vector.shape_cast %63 : vector<1x1x8x4xf32> to vector<8x4xf32>
    %65 = vector.extract_strided_slice %40 {offsets = [0, 12], sizes = [8, 4], strides = [1, 1]} : vector<8x16xf32> to vector<8x4xf32>
    %66 = arith.addf %64, %65 : vector<8x4xf32>
    %c0_42 = arith.constant 0 : index
    %c0_43 = arith.constant 0 : index
    %c3_44 = arith.constant 3 : index
    %c0_45 = arith.constant 0 : index
    %67 = vector.load %arg7[%c0_42, %c0_43, %c3_44, %c0_45] : memref<1x1x11x4xf32, #tpu.memory_space<vmem>>, vector<1x1x8x4xf32>
    %68 = vector.shape_cast %67 : vector<1x1x8x4xf32> to vector<8x4xf32>
    %69 = vector.shape_cast %66 : vector<8x4xf32> to vector<1x1x8x4xf32>
    tpu.vector_store %arg7[%c0_42, %c0_43, %c3_44, %c0_45], %69 {strides = array<i32>} : memref<1x1x11x4xf32, #tpu.memory_space<vmem>>, vector<1x1x8x4xf32>,
    return
  }
  func.func @transform_0(%arg0: i32, %arg1: i32) -> (i32, i32, i32) {
    %c0_i32 = arith.constant 0 : i32
    %c0_i32_0 = arith.constant 0 : i32
    return %arg0, %arg1, %c0_i32 : i32, i32, i32
  }
  func.func @transform_1(%arg0: i32, %arg1: i32) -> (i32, i32) {
    %c0_i32 = arith.constant 0 : i32
    %c0_i32_0 = arith.constant 0 : i32
    %c0_i32_1 = arith.constant 0 : i32
    return %c0_i32, %c0_i32_0 : i32, i32
  }
  func.func @transform_2(%arg0: i32, %arg1: i32) -> (i32, i32) {
    %c0_i32 = arith.constant 0 : i32
    %c0_i32_0 = arith.constant 0 : i32
    %c0_i32_1 = arith.constant 0 : i32
    return %c0_i32, %c0_i32_0 : i32, i32
  }
  func.func @transform_3(%arg0: i32, %arg1: i32) -> (i32, i32) {
    %c0_i32 = arith.constant 0 : i32
    %c0_i32_0 = arith.constant 0 : i32
    %c0_i32_1 = arith.constant 0 : i32
    return %c0_i32, %c0_i32_0 : i32, i32
  }
  func.func @transform_4(%arg0: i32, %arg1: i32) -> (i32, i32) {
    %c0_i32 = arith.constant 0 : i32
    %c0_i32_0 = arith.constant 0 : i32
    %c0_i32_1 = arith.constant 0 : i32
    return %c0_i32, %c0_i32_0 : i32, i32
  }
  func.func @transform_5(%arg0: i32, %arg1: i32) -> (i32, i32, i32, i32) {
    %c0_i32 = arith.constant 0 : i32
    %c0_i32_0 = arith.constant 0 : i32
    %c0_i32_1 = arith.constant 0 : i32
    return %arg0, %arg1, %c0_i32, %c0_i32_0 : i32, i32, i32, i32
  }
}

</mosaic_0001>

<bundles_post_ra>
// kernel: tpu_custom_call.1
= control target key start
LH: loop header
LB: loop body
LE: loop exit
PB: predicated region body
PF: predicated region fallthrough
CT: control target
= control target key end

     0   :  { %s897_s18 = smov 0   ;;  %s899_s19 = smov 0   ;;  %s984_s0 = inlined_call_operand.vmem [shape: bf16[2,8,32], index: 0, kind: input, shape index: {}]   ;;  %s985_s1 = inlined_call_operand.vmem [shape: bf16[32,18], index: 1, kind: input, shape index: {}]   ;;  %s986_s2 = inlined_call_operand.vmem [shape: f32[1,18], index: 2, kind: input, shape index: {}]   ;;  %s987_s3 = inlined_call_operand.vmem [shape: bf16[16,16], index: 3, kind: input, shape index: {}]   ;;  %s988_s4 = inlined_call_operand.vmem [shape: f32[1,16], index: 4, kind: input, shape index: {}]   ;;  %s989_s5 = inlined_call_operand.vmem [shape: f32[2,1,11,4], index: 5, kind: output, shape index: {}]  }
   0x1   :  { %s901_s20 = smov 0  }
   0x2 LB: > { %s27_s21 = sadd.s32 1, %s847_s19  ;;  %p736_p0 = scmp.ge.s32.totalorder %s851_s20, 1  ;;  %s851_s20 = sphi %s901_s20, %s15_s20   ;;  %s847_s19 = sphi %s899_s19, %s991_s19   ;;  %s843_s18 = sphi %s897_s18, %s990_s18  }
   0x3   : > { %p29_p1 = scmp.ge.s32.totalorder %s27_s21, 2  ;;  %p205_p2 = scmp.lt.s32.totalorder %s851_s20, 3 }
   0x5   : > { %s993_s21 = smov (%p29_p1, %s27_s21), 0  ;;  %p206_p3 = pnand %p736_p0, %p205_p2 }
   0x6   : > { %v820_v0 = vld [vmem:[%s985_s1] sm:$0xff] (!%p206_p3)   ;;  %v853_v1 = vmov (!%p206_p3), 0.0   ;;  %v821_v2 = vld [vmem:[%s985_s1 + $0x8] sm:$0xff] (!%p206_p3)   ;;  %vm854_vm0 = vmmov (!%p206_p3), 0   ;;  %p239_p4 = scmp.lt.s32.totalorder (!%p206_p3), %s843_s18, 1  ;;  %vm280_vm1 = vcmask (!%p206_p3), 261120  }
   0x7   : > { %209 = sbr.rel (%p206_p3) target bundleno = 898 (0x382), region = 40  ;;  %763 = vmatprep.subr.bf16.mxu0 (!%p206_p3), %v853_v1  ;;  %771 = vmatprep.subr.bf16.mxu1 (!%p206_p3), %v853_v1  ;;  %v740_v4 = vld [vmem:[%s986_s2] ss:$0 sm:$0xff] (!%p206_p3)  ;;  %v855_v20 = vmov (!%p206_p3), 683565275   ;;  %s861_s9 = smov (!%p206_p3), 120  }
   0x8   : > { %764 = vmatpush3.bf16.msra.mxu0 (!%p206_p3), %v820_v0  ;;  %767 = vmatprep.mubr.msk.bf16.mxu0 (!%p206_p3), %vm854_vm0, %v853_v1  ;;  %v856_v22 = vmov (!%p206_p3), 2475754826   ;;  %v857_v25 = vmov (!%p206_p3), 2131351028   ;;  %v858_v28 = vmov (!%p206_p3), 2102212464  }
   0x9   : > { %765 = vmatprep.subr.bf16.mxu0 (!%p206_p3), %v853_v1  ;;  %773 = vmatprep.mubr.msk.bf16.mxu1 (!%p206_p3), %vm854_vm0, %v853_v1  ;;  %v859_v31 = vmov (!%p206_p3), 920167782   ;;  %v860_v34 = vmov (!%p206_p3), 1326507024   ;;  %s863_s10 = smov (!%p206_p3), 8   ;;  %s864_s11 = smov (!%p206_p3), 127  }
   0xa   : > { %s866_s22 = smov (!%p206_p3), 124  }
   0xc   : > { %766 = vmatpush3.bf16.msra.mxu0 (!%p206_p3), %v821_v2 }
   0xe   : > { %s995_s18 = smov (!%p239_p4, %s843_s18), 1 }
   0xf   : > { %s737_s26 = sshll.u32 %s995_s18, 2  ;;  %s757_s12 = sshll.u32 %s995_s18, 4 }
  0x10   : > { %s245_s29 = scalar_lea.vmem %s984_s0, %s737_s26  ;;  %s254_s15 = scalar_lea.vmem %s989_s5, %s757_s12 }
  0x11   : > { %v256_v3 = vld [vmem:[%s245_s29] sm:$0xf]  ;;  %s865_s18 = smov 116  }
  0x12   : > { %768 = vmatmul.mubr.msk.bf16.vlgmr.msra.gmra.mrb[0].mxu0 %vm280_vm1, %v256_v3 }
  0xe5   : > { %v318_v5 = vpop.f32.mrb[0].mxu0 }
  0xe6   : > { %v935_v6 = vadd.f32 %v740_v4, %v318_v5  ;;  %v769_v7 = vpop.f32.mrb[1].mxu0 }
  0xe7   : > { %v321_v8 = vpop.f32.mrb[2].mxu0 }
  0xe8   : > { %v332_v9 = vand.u32 2139095040, %v935_v6  ;;  %v770_v10 = vpop.f32.mrb[3].mxu0  ;;  %v329_v14 = vand.u32 2147483647, %v935_v6  ;;  %vm331_vm9 = vcmp.lt.s32.totalorder %v935_v6, 0  ;;  %vm421_vm1 = vweird.f32 %v935_v6 }
  0xea   : > { %v333_v11 = vshrl.u32 %v332_v9, 23  ;;  %v336_v18 = vand.u32 8388607, %v329_v14  ;;  %vm330_vm10 = vcmp.le.f32.partialorder %v329_v14, 0.7853982  ;;  %v822_v14 = vld [vmem:[%s987_s3] sm:$0xff]  }
  0xeb   : > { %772 = vmatpush3.bf16.msra.mxu1 %v822_v14 }
  0xec   : > { %v744_v12 = vadd.s32 4294967169, %v333_v11  ;;  %v337_v36 = vor.u32 8388608, %v336_v18 }
  0xee   : > { %v339_v13 = vadd.s32 1, %v744_v12  ;;  %v377_v50 = vshll.u32 %v337_v36, 8 }
  0xf0   : > { %vm340_vm2 = vcmp.gt.s32.totalorder %v339_v13, 0 }
  0xf1   : > { %v341_v15 = vsel %vm340_vm2, %v339_v13, 0 }
  0xf2   : > { %v343_v16 = vand.u32 31, %v341_v15  ;;  %v342_v19 = vshrl.u32 %v341_v15, 5 }
  0xf4   : > { %v344_v17 = vsub.s32 32, %v343_v16  ;;  %v346_v21 = vshll.u32 %v855_v20, %v343_v16  ;;  %v349_v23 = vshll.u32 %v856_v22, %v343_v16  ;;  %v352_v27 = vshll.u32 %v857_v25, %v343_v16 }
  0xf5   : > { %v355_v30 = vshll.u32 %v858_v28, %v343_v16  ;;  %v358_v33 = vshll.u32 %v859_v31, %v343_v16  ;;  %vm361_vm3 = vcmp.lt.s32.totalorder %v342_v19, 1  ;;  %vm364_vm4 = vcmp.lt.s32.totalorder %v342_v19, 4 }
  0xf6   : > { %v347_v24 = vshrl.u32 %v856_v22, %v344_v17  ;;  %v350_v26 = vshrl.u32 %v857_v25, %v344_v17  ;;  %v353_v29 = vshrl.u32 %v858_v28, %v344_v17  ;;  %v356_v32 = vshrl.u32 %v859_v31, %v344_v17 }
  0xf7   : > { %v359_v35 = vshrl.u32 %v860_v34, %v344_v17  ;;  %v345_v45 = vshrl.u32 %v855_v20, %v344_v17  ;;  %vm363_vm5 = vcmp.lt.s32.totalorder %v342_v19, 3  ;;  %vm362_vm6 = vcmp.lt.s32.totalorder %v342_v19, 2 }
  0xf8   : > { %v348_v37 = vor.u32 %v347_v24, %v346_v21  ;;  %v351_v38 = vor.u32 %v350_v26, %v349_v23  ;;  %v354_v39 = vor.u32 %v353_v29, %v352_v27  ;;  %v357_v40 = vor.u32 %v356_v32, %v355_v30 }
  0xf9   : > { %v360_v41 = vor.u32 %v359_v35, %v358_v33 }
  0xfa   : > { %v366_v42 = vsel %vm364_vm4, %v354_v39, 2102212464  ;;  %v369_v43 = vsel %vm361_vm3, %v348_v37, %v351_v38  ;;  %v373_v44 = vsel %vm361_vm3, %v351_v38, %v354_v39  ;;  %v370_v46 = vsel %vm364_vm4, %v357_v40, 920167782 }
  0xfb   : > { %v374_v47 = vsel %vm364_vm4, %v360_v41, 1326507024  ;;  %v371_v48 = vsel %vm363_vm5, %v354_v39, %v370_v46  ;;  %v365_v51 = vsel %vm361_vm3, %v345_v45, %v348_v37  ;;  %v367_v52 = vsel %vm363_vm5, %v351_v38, %v366_v42 }
  0xfc   : > { %v375_v49 = vsel %vm363_vm5, %v357_v40, %v374_v47  ;;  %v372_v53 = vsel %vm362_vm6, %v369_v43, %v371_v48  ;;  %v368_v59 = vsel %vm362_vm6, %v365_v51, %v367_v52  ;;  %v324_v45 = vmul.f32 1.442695, %v935_v6 }
  0xfd   : > { %v376_v54 = vsel %vm362_vm6, %v373_v44, %v375_v49  ;;  %v944_v57 = vmul.u32.u64.low %v377_v50, %v372_v53  ;;  %v945_v58 = vmul.u32.u64.high %v377_v50, %v372_v53, %v944_v57  ;;  %v384_v61 = vmul.u32 %v377_v50, %v368_v59  ;;  %v752_v59 = vld [vmem:[%s988_s4] ss:$0 sm:$0xff] }
  0xfe   : > { %v941_v55 = vmul.u32.u64.low %v377_v50, %v376_v54  ;;  %v942_v56 = vmul.u32.u64.high %v377_v50, %v376_v54, %v941_v55  ;;  %v862_v48 = vmov 16   ;;  %vm555_vm3 = vcmask 64512  }
  0xff   : > { %v387_v60 = vadd.s32 1, %v945_v58  ;;  %819 = vset.pattern.permute.xlu0 %v862_v48  ;;  %vm580_vm4 = vcmask 130048   ;;  %vm625_vm5 = vcmask 26624   ;;  %vm623_vm6 = vcmask 31744  }
 0x100   : > { %vm386_vm7 = vc.u32 %v942_v56, %v944_v57  ;;  %v385_v11 = vadd.s32 %v944_v57, %v942_v56  ;;  %626 = vst.msk [vmem:[%s254_s15 + $0x8] sm:$0x7] %vm625_vm5, %v853_v1 }
 0x101   : > { %v388_v62 = vsel %vm386_vm7, %v387_v60, %v945_v58 }
 0x102   : > { %v389_v63 = vadd.s32 %v388_v62, %v384_v61 }
 0x104   : > { %v390_v0 = vadd.s32 536870912, %v389_v63 }
 0x106   : > { %v391_v2 = vshrl.u32 %v390_v0, 30 }
 0x108   : > { %v392_v3 = vshll.u32 %v391_v2, 30  ;;  %v415_v24 = vsub.s32 4, %v391_v2 }
 0x10a   : > { %v393_v4 = vsub.s32 %v389_v63, %v392_v3  ;;  %v416_v27 = vsel %vm331_vm9, %v415_v24, %v391_v2 }
 0x10b   : > { %v418_v29 = vsel %vm330_vm10, 0, %v416_v27 }
 0x10c   : > { %v395_v5 = vsub.s32 0, %v393_v4  ;;  %v531_v30 = vadd.s32 3, %v418_v29  ;;  %v422_v32 = vand.u32 3, %v418_v29 }
 0x10e   : > { %v745_v7 = vmin.u32 %v395_v5, %v393_v4  ;;  %v532_v31 = vand.u32 3, %v531_v30  ;;  %vm427_vm12 = vcmp.eq.s32.totalorder %v422_v32, 2  ;;  %vm424_vm14 = vcmp.eq.s32.totalorder %v422_v32, 0 }
 0x10f   : > { %vm423_vm0 = vcmp.lt.s32.totalorder %v422_v32, 2 }
 0x110   : > { %v397_v8 = vclz %v745_v7  ;;  %vm537_vm11 = vcmp.eq.s32.totalorder %v532_v31, 2  ;;  %vm534_vm13 = vcmp.eq.s32.totalorder %v532_v31, 0  ;;  %vm533_vm15 = vcmp.lt.s32.totalorder %v532_v31, 2 }
 0x112   : > { %v746_v9 = vadd.s32 4294967294, %v397_v8 }
 0x114   : > { %vm747_vm8 = vcmp.lt.s32.totalorder %v746_v9, 0 }
 0x115   : > { %v400_v10 = vsel %vm747_vm8, 0, %v746_v9 }
 0x116   : > { %v401_v12 = vsub.s32 32, %v400_v10  ;;  %v405_v13 = vsub.s32 4294967266, %v400_v10  ;;  %v402_v15 = vshll.u32 %v393_v4, %v400_v10 }
 0x118   : > { %v403_v16 = vshrl.u32 %v385_v11, %v401_v12  ;;  %v406_v17 = vadd.s32 127, %v405_v13 }
 0x11a   : > { %v404_v18 = vor.u32 %v403_v16, %v402_v15  ;;  %v407_v19 = vshll.u32 %v406_v17, 23 }
 0x11c   : > { %v408_v20 = vor.u32 4788187, %v407_v19  ;;  %v411_v22 = vcvt.s32.f32 %v404_v18 }
 0x11e   : > { %v409_v21 = vand.u32 2147483647, %v408_v20 }
 0x120   : > { %v412_v23 = vmul.f32 %v411_v22, %v409_v21 }
 0x122   : > { %v413_v25 = vxor.u32 2147483648, %v412_v23 }
 0x124   : > { %v414_v26 = vsel %vm331_vm9, %v413_v25, %v412_v23 }
 0x125   : > { %v417_v28 = vsel %vm330_vm10, %v935_v6, %v414_v26 }
 0x126   : > { %823 = vcosq.f32 %v417_v28 }
 0x127   : > { %825 = vsinq.f32 %v417_v28 }
 0x128   : > { %827 = vpow2.f32 %v324_v45 }
 0x130   : > { %v824_v33 = vpop.eup %823 }
 0x131   : > { %v826_v34 = vpop.eup %825  ;;  %v428_v35 = vxor.u32 2147483648, %v824_v33 }
 0x132   : > { %v425_v36 = vxor.u32 2147483648, %v826_v34  ;;  %v828_v46 = vpop.eup %827 }
 0x133   : > { %v539_v37 = vsel %vm537_vm11, %v428_v35, %v826_v34  ;;  %v429_v38 = vsel %vm427_vm12, %v428_v35, %v826_v34  ;;  %v326_v47 = vmin.f32 %v828_v46, 100.0 }
 0x134   : > { %v536_v39 = vsel %vm534_vm13, %v824_v33, %v425_v36  ;;  %v426_v40 = vsel %vm424_vm14, %v824_v33, %v425_v36 }
 0x135   : > { %v540_v41 = vsel %vm533_vm15, %v536_v39, %v539_v37  ;;  %v430_v42 = vsel %vm423_vm0, %v426_v40, %v429_v38  ;;  %vm327_vm2 = vcmp.lt.f32.partialorder %v326_v47, 0.01 }
 0x136   : > { %v541_v43 = vsel %vm421_vm1, nan, %v540_v41  ;;  %v431_v44 = vsel %vm421_vm1, nan, %v430_v42  ;;  %v328_v50 = vsel %vm327_vm2, 0.0, %v326_v47 }
 0x137   : > { %543 = vrot.lane.b32.xlu0 %v541_v43, %s861_s9 }
 0x13b   : > { %433 = vrot.lane.b32.xlu0 %v431_v44, %s861_s9 }
 0x1a9   : > { %v544_v49 = vpop.permute.xlu0 %543 }
 0x1aa   : > { %v546_v51 = vmul.f32 %v544_v49, %v328_v50 }
 0x1ac   : > { %v547_v52 = vpack.c.bf16 %v546_v51, %v546_v51 }
 0x1ad   : > { %v434_v53 = vpop.permute.xlu0 %433 }
 0x1ae   : > { %553 = vrot.lane.b32.xlu1 %v547_v52, %s863_s10  ;;  %v436_v54 = vmul.f32 %v434_v53, %v328_v50 }
 0x1b0   : > { %v437_v55 = vpack.c.bf16 %v436_v54, %v436_v54 }
 0x1b2   : > { %548 = vrot.lane.b32.xlu1 %v431_v44, %s864_s11 }
 0x220   : > { %v554_v6 = vpop.permute.xlu1 %553 }
 0x221   : > { %v558_v56 = vsel %vm555_vm3, %v437_v55, %v554_v6 }
 0x222   : > { %774 = vmatmul.mubr.msk.bf16.vlgmr.msra.gmra.mrb[0].mxu1 %vm580_vm4, %v558_v56 }
 0x224   : > { %v549_v57 = vpop.permute.xlu1 %548 }
 0x225   : > { %v551_v58 = vmul.f32 %v549_v57, %v328_v50 }
 0x227   : > { %564 = vperm.xlu0 %819, %v551_v58  }
 0x2a6   : > { %v565_v60 = vpop.permute.xlu0 %564 }
 0x2a7   : > { %v573_v61 = vmul.f32 %v752_v59, %v565_v60 }
 0x2f5   : > { %v617_v62 = vpop.f32.mrb[0].mxu1 }
 0x2f6   : > { %v618_v63 = vadd.f32 %v617_v62, %v573_v61  ;;  %v775_v0 = vpop.f32.mrb[1].mxu1 }
 0x2f7   : > { %v620_v2 = vpop.f32.mrb[2].mxu1 }
 0x2f8   : > { %624 = vst.msk [vmem:[%s254_s15] sm:$0xff] %vm623_vm6, %v618_v63  ;;  %641 = vrot.lane.b32.xlu0 %v618_v63, %s865_s18  ;;  %629 = vrot.lane.b32.xlu1 %v618_v63, %s866_s22  ;;  %v776_v3 = vpop.f32.mrb[3].mxu1 }
 0x2fc   : > { %635 = vrot.lane.b32.xlu1 %v618_v63, %s861_s9 }
 0x2ff   : > { %v627_v4 = vld [vmem:[%s254_s15 + $0x1] sm:$0xff] }
 0x36a   : > { %v630_v1 = vpop.permute.xlu1 %629  ;;  %v642_v10 = vpop.permute.xlu0 %641 }
 0x36b   : > { %v632_v5 = vadd.f32 %v630_v1, %v627_v4 }
 0x36d   : > { %633 = vst.msk [vmem:[%s254_s15 + $0x1] sm:$0xff] %vm623_vm6, %v632_v5 }
 0x36e   : > { %v636_v7 = vpop.permute.xlu1 %635 }
 0x374   : > { %v634_v8 = vld [vmem:[%s254_s15 + $0x2] sm:$0xff] }
 0x375   : > { %v638_v9 = vadd.f32 %v636_v7, %v634_v8 }
 0x377   : > { %639 = vst.msk [vmem:[%s254_s15 + $0x2] sm:$0xff] %vm623_vm6, %v638_v9 }
 0x37e   : > { %v640_v11 = vld [vmem:[%s254_s15 + $0x3] sm:$0xff] }
 0x37f   : > { %v644_v12 = vadd.f32 %v642_v10, %v640_v11 }
 0x381   : > { %645 = vst.msk [vmem:[%s254_s15 + $0x3] sm:$0xff] %vm623_vm6, %v644_v12 }
 0x382 PF: > { %s15_s20 = sadd.s32 1, %s851_s20   ;;  %s990_s18 = smov %s847_s19 }
 0x383   : > { %p12_p5 = scmp.ge.s32.totalorder %s15_s20, 4   ;;  %s991_s19 = smov %s993_s21 }
 0x385   :  { %14 = sbr.rel (!%p12_p5) target bundleno = 2 (0x2), region = 70 }

// kernel: tpu_custom_call.1
= control target key start
LH: loop header
LB: loop body
LE: loop exit
PB: predicated region body
PF: predicated region fallthrough
CT: control target
= control target key end

     0   :  { %s897_s18 = smov 0   ;;  %s899_s19 = smov 0   ;;  %s984_s0 = inlined_call_operand.vmem [shape: bf16[2,8,32], index: 0, kind: input, shape index: {}]   ;;  %s985_s1 = inlined_call_operand.vmem [shape: bf16[32,18], index: 1, kind: input, shape index: {}]   ;;  %s986_s2 = inlined_call_operand.vmem [shape: f32[1,18], index: 2, kind: input, shape index: {}]   ;;  %s987_s3 = inlined_call_operand.vmem [shape: bf16[16,16], index: 3, kind: input, shape index: {}]   ;;  %s988_s4 = inlined_call_operand.vmem [shape: f32[1,16], index: 4, kind: input, shape index: {}]   ;;  %s989_s5 = inlined_call_operand.vmem [shape: f32[2,1,11,4], index: 5, kind: output, shape index: {}]  }
   0x1   :  { %s901_s20 = smov 0  }
   0x2 LB: > { %s27_s21 = sadd.s32 1, %s847_s19  ;;  %p736_p0 = scmp.ge.s32.totalorder %s851_s20, 1  ;;  %s851_s20 = sphi %s901_s20, %s15_s20   ;;  %s847_s19 = sphi %s899_s19, %s991_s19   ;;  %s843_s18 = sphi %s897_s18, %s990_s18  }
   0x3   : > { %p29_p1 = scmp.ge.s32.totalorder %s27_s21, 2  ;;  %p205_p2 = scmp.lt.s32.totalorder %s851_s20, 3 }
   0x5   : > { %s993_s21 = smov (%p29_p1, %s27_s21), 0  ;;  %p206_p3 = pnand %p736_p0, %p205_p2 }
   0x6   : > { %v820_v0 = vld [vmem:[%s985_s1] sm:$0xff] (!%p206_p3)   ;;  %v853_v1 = vmov (!%p206_p3), 0.0   ;;  %v821_v2 = vld [vmem:[%s985_s1 + $0x8] sm:$0xff] (!%p206_p3)   ;;  %vm854_vm0 = vmmov (!%p206_p3), 0   ;;  %p239_p4 = scmp.lt.s32.totalorder (!%p206_p3), %s843_s18, 1  ;;  %vm280_vm1 = vcmask (!%p206_p3), 261120  }
   0x7   : > { %209 = sbr.rel (%p206_p3) target bundleno = 898 (0x382), region = 40  ;;  %763 = vmatprep.subr.bf16.mxu0 (!%p206_p3), %v853_v1  ;;  %771 = vmatprep.subr.bf16.mxu1 (!%p206_p3), %v853_v1  ;;  %v740_v4 = vld [vmem:[%s986_s2] ss:$0 sm:$0xff] (!%p206_p3)  ;;  %v855_v20 = vmov (!%p206_p3), 683565275   ;;  %s861_s9 = smov (!%p206_p3), 120  }
   0x8   : > { %764 = vmatpush3.bf16.msra.mxu0 (!%p206_p3), %v820_v0  ;;  %767 = vmatprep.mubr.msk.bf16.mxu0 (!%p206_p3), %vm854_vm0, %v853_v1  ;;  %v856_v22 = vmov (!%p206_p3), 2475754826   ;;  %v857_v25 = vmov (!%p206_p3), 2131351028   ;;  %v858_v28 = vmov (!%p206_p3), 2102212464  }
   0x9   : > { %765 = vmatprep.subr.bf16.mxu0 (!%p206_p3), %v853_v1  ;;  %773 = vmatprep.mubr.msk.bf16.mxu1 (!%p206_p3), %vm854_vm0, %v853_v1  ;;  %v859_v31 = vmov (!%p206_p3), 920167782   ;;  %v860_v34 = vmov (!%p206_p3), 1326507024   ;;  %s863_s10 = smov (!%p206_p3), 8   ;;  %s864_s11 = smov (!%p206_p3), 127  }
   0xa   : > { %s866_s22 = smov (!%p206_p3), 124  }
   0xc   : > { %766 = vmatpush3.bf16.msra.mxu0 (!%p206_p3), %v821_v2 }
   0xe   : > { %s995_s18 = smov (!%p239_p4, %s843_s18), 1 }
   0xf   : > { %s737_s26 = sshll.u32 %s995_s18, 2  ;;  %s757_s12 = sshll.u32 %s995_s18, 4 }
  0x10   : > { %s245_s29 = scalar_lea.vmem %s984_s0, %s737_s26  ;;  %s254_s15 = scalar_lea.vmem %s989_s5, %s757_s12 }
  0x11   : > { %v256_v3 = vld [vmem:[%s245_s29] sm:$0xf]  ;;  %s865_s18 = smov 116  }
  0x12   : > { %768 = vmatmul.mubr.msk.bf16.vlgmr.msra.gmra.mrb[0].mxu0 %vm280_vm1, %v256_v3 }
  0xe5   : > { %v318_v5 = vpop.f32.mrb[0].mxu0 }
  0xe6   : > { %v935_v6 = vadd.f32 %v740_v4, %v318_v5  ;;  %v769_v7 = vpop.f32.mrb[1].mxu0 }
  0xe7   : > { %v321_v8 = vpop.f32.mrb[2].mxu0 }
  0xe8   : > { %v332_v9 = vand.u32 2139095040, %v935_v6  ;;  %v770_v10 = vpop.f32.mrb[3].mxu0  ;;  %v329_v14 = vand.u32 2147483647, %v935_v6  ;;  %vm331_vm9 = vcmp.lt.s32.totalorder %v935_v6, 0  ;;  %vm421_vm1 = vweird.f32 %v935_v6 }
  0xea   : > { %v333_v11 = vshrl.u32 %v332_v9, 23  ;;  %v336_v18 = vand.u32 8388607, %v329_v14  ;;  %vm330_vm10 = vcmp.le.f32.partialorder %v329_v14, 0.7853982  ;;  %v822_v14 = vld [vmem:[%s987_s3] sm:$0xff]  }
  0xeb   : > { %772 = vmatpush3.bf16.msra.mxu1 %v822_v14 }
  0xec   : > { %v744_v12 = vadd.s32 4294967169, %v333_v11  ;;  %v337_v36 = vor.u32 8388608, %v336_v18 }
  0xee   : > { %v339_v13 = vadd.s32 1, %v744_v12  ;;  %v377_v50 = vshll.u32 %v337_v36, 8 }
  0xf0   : > { %vm340_vm2 = vcmp.gt.s32.totalorder %v339_v13, 0 }
  0xf1   : > { %v341_v15 = vsel %vm340_vm2, %v339_v13, 0 }
  0xf2   : > { %v343_v16 = vand.u32 31, %v341_v15  ;;  %v342_v19 = vshrl.u32 %v341_v15, 5 }
  0xf4   : > { %v344_v17 = vsub.s32 32, %v343_v16  ;;  %v346_v21 = vshll.u32 %v855_v20, %v343_v16  ;;  %v349_v23 = vshll.u32 %v856_v22, %v343_v16  ;;  %v352_v27 = vshll.u32 %v857_v25, %v343_v16 }
  0xf5   : > { %v355_v30 = vshll.u32 %v858_v28, %v343_v16  ;;  %v358_v33 = vshll.u32 %v859_v31, %v343_v16  ;;  %vm361_vm3 = vcmp.lt.s32.totalorder %v342_v19, 1  ;;  %vm364_vm4 = vcmp.lt.s32.totalorder %v342_v19, 4 }
  0xf6   : > { %v347_v24 = vshrl.u32 %v856_v22, %v344_v17  ;;  %v350_v26 = vshrl.u32 %v857_v25, %v344_v17  ;;  %v353_v29 = vshrl.u32 %v858_v28, %v344_v17  ;;  %v356_v32 = vshrl.u32 %v859_v31, %v344_v17 }
  0xf7   : > { %v359_v35 = vshrl.u32 %v860_v34, %v344_v17  ;;  %v345_v45 = vshrl.u32 %v855_v20, %v344_v17  ;;  %vm363_vm5 = vcmp.lt.s32.totalorder %v342_v19, 3  ;;  %vm362_vm6 = vcmp.lt.s32.totalorder %v342_v19, 2 }
  0xf8   : > { %v348_v37 = vor.u32 %v347_v24, %v346_v21  ;;  %v351_v38 = vor.u32 %v350_v26, %v349_v23  ;;  %v354_v39 = vor.u32 %v353_v29, %v352_v27  ;;  %v357_v40 = vor.u32 %v356_v32, %v355_v30 }
  0xf9   : > { %v360_v41 = vor.u32 %v359_v35, %v358_v33 }
  0xfa   : > { %v366_v42 = vsel %vm364_vm4, %v354_v39, 2102212464  ;;  %v369_v43 = vsel %vm361_vm3, %v348_v37, %v351_v38  ;;  %v373_v44 = vsel %vm361_vm3, %v351_v38, %v354_v39  ;;  %v370_v46 = vsel %vm364_vm4, %v357_v40, 920167782 }
  0xfb   : > { %v374_v47 = vsel %vm364_vm4, %v360_v41, 1326507024  ;;  %v371_v48 = vsel %vm363_vm5, %v354_v39, %v370_v46  ;;  %v365_v51 = vsel %vm361_vm3, %v345_v45, %v348_v37  ;;  %v367_v52 = vsel %vm363_vm5, %v351_v38, %v366_v42 }
  0xfc   : > { %v375_v49 = vsel %vm363_vm5, %v357_v40, %v374_v47  ;;  %v372_v53 = vsel %vm362_vm6, %v369_v43, %v371_v48  ;;  %v368_v59 = vsel %vm362_vm6, %v365_v51, %v367_v52  ;;  %v324_v45 = vmul.f32 1.442695, %v935_v6 }
  0xfd   : > { %v376_v54 = vsel %vm362_vm6, %v373_v44, %v375_v49  ;;  %v944_v57 = vmul.u32.u64.low %v377_v50, %v372_v53  ;;  %v945_v58 = vmul.u32.u64.high %v377_v50, %v372_v53, %v944_v57  ;;  %v384_v61 = vmul.u32 %v377_v50, %v368_v59  ;;  %v752_v59 = vld [vmem:[%s988_s4] ss:$0 sm:$0xff] }
  0xfe   : > { %v941_v55 = vmul.u32.u64.low %v377_v50, %v376_v54  ;;  %v942_v56 = vmul.u32.u64.high %v377_v50, %v376_v54, %v941_v55  ;;  %v862_v48 = vmov 16   ;;  %vm555_vm3 = vcmask 64512  }
  0xff   : > { %v387_v60 = vadd.s32 1, %v945_v58  ;;  %819 = vset.pattern.permute.xlu0 %v862_v48  ;;  %vm580_vm4 = vcmask 130048   ;;  %vm625_vm5 = vcmask 26624   ;;  %vm623_vm6 = vcmask 31744  }
 0x100   : > { %vm386_vm7 = vc.u32 %v942_v56, %v944_v57  ;;  %v385_v11 = vadd.s32 %v944_v57, %v942_v56  ;;  %626 = vst.msk [vmem:[%s254_s15 + $0x8] sm:$0x7] %vm625_vm5, %v853_v1 }
 0x101   : > { %v388_v62 = vsel %vm386_vm7, %v387_v60, %v945_v58 }
 0x102   : > { %v389_v63 = vadd.s32 %v388_v62, %v384_v61 }
 0x104   : > { %v390_v0 = vadd.s32 536870912, %v389_v63 }
 0x106   : > { %v391_v2 = vshrl.u32 %v390_v0, 30 }
 0x108   : > { %v392_v3 = vshll.u32 %v391_v2, 30  ;;  %v415_v24 = vsub.s32 4, %v391_v2 }
 0x10a   : > { %v393_v4 = vsub.s32 %v389_v63, %v392_v3  ;;  %v416_v27 = vsel %vm331_vm9, %v415_v24, %v391_v2 }
 0x10b   : > { %v418_v29 = vsel %vm330_vm10, 0, %v416_v27 }
 0x10c   : > { %v395_v5 = vsub.s32 0, %v393_v4  ;;  %v531_v30 = vadd.s32 3, %v418_v29  ;;  %v422_v32 = vand.u32 3, %v418_v29 }
 0x10e   : > { %v745_v7 = vmin.u32 %v395_v5, %v393_v4  ;;  %v532_v31 = vand.u32 3, %v531_v30  ;;  %vm427_vm12 = vcmp.eq.s32.totalorder %v422_v32, 2  ;;  %vm424_vm14 = vcmp.eq.s32.totalorder %v422_v32, 0 }
 0x10f   : > { %vm423_vm0 = vcmp.lt.s32.totalorder %v422_v32, 2 }
 0x110   : > { %v397_v8 = vclz %v745_v7  ;;  %vm537_vm11 = vcmp.eq.s32.totalorder %v532_v31, 2  ;;  %vm534_vm13 = vcmp.eq.s32.totalorder %v532_v31, 0  ;;  %vm533_vm15 = vcmp.lt.s32.totalorder %v532_v31, 2 }
 0x112   : > { %v746_v9 = vadd.s32 4294967294, %v397_v8 }
 0x114   : > { %vm747_vm8 = vcmp.lt.s32.totalorder %v746_v9, 0 }
 0x115   : > { %v400_v10 = vsel %vm747_vm8, 0, %v746_v9 }
 0x116   : > { %v401_v12 = vsub.s32 32, %v400_v10  ;;  %v405_v13 = vsub.s32 4294967266, %v400_v10  ;;  %v402_v15 = vshll.u32 %v393_v4, %v400_v10 }
 0x118   : > { %v403_v16 = vshrl.u32 %v385_v11, %v401_v12  ;;  %v406_v17 = vadd.s32 127, %v405_v13 }
 0x11a   : > { %v404_v18 = vor.u32 %v403_v16, %v402_v15  ;;  %v407_v19 = vshll.u32 %v406_v17, 23 }
 0x11c   : > { %v408_v20 = vor.u32 4788187, %v407_v19  ;;  %v411_v22 = vcvt.s32.f32 %v404_v18 }
 0x11e   : > { %v409_v21 = vand.u32 2147483647, %v408_v20 }
 0x120   : > { %v412_v23 = vmul.f32 %v411_v22, %v409_v21 }
 0x122   : > { %v413_v25 = vxor.u32 2147483648, %v412_v23 }
 0x124   : > { %v414_v26 = vsel %vm331_vm9, %v413_v25, %v412_v23 }
 0x125   : > { %v417_v28 = vsel %vm330_vm10, %v935_v6, %v414_v26 }
 0x126   : > { %823 = vcosq.f32 %v417_v28 }
 0x127   : > { %825 = vsinq.f32 %v417_v28 }
 0x128   : > { %827 = vpow2.f32 %v324_v45 }
 0x130   : > { %v824_v33 = vpop.eup %823 }
 0x131   : > { %v826_v34 = vpop.eup %825  ;;  %v428_v35 = vxor.u32 2147483648, %v824_v33 }
 0x132   : > { %v425_v36 = vxor.u32 2147483648, %v826_v34  ;;  %v828_v46 = vpop.eup %827 }
 0x133   : > { %v539_v37 = vsel %vm537_vm11, %v428_v35, %v826_v34  ;;  %v429_v38 = vsel %vm427_vm12, %v428_v35, %v826_v34  ;;  %v326_v47 = vmin.f32 %v828_v46, 100.0 }
 0x134   : > { %v536_v39 = vsel %vm534_vm13, %v824_v33, %v425_v36  ;;  %v426_v40 = vsel %vm424_vm14, %v824_v33, %v425_v36 }
 0x135   : > { %v540_v41 = vsel %vm533_vm15, %v536_v39, %v539_v37  ;;  %v430_v42 = vsel %vm423_vm0, %v426_v40, %v429_v38  ;;  %vm327_vm2 = vcmp.lt.f32.partialorder %v326_v47, 0.01 }
 0x136   : > { %v541_v43 = vsel %vm421_vm1, nan, %v540_v41  ;;  %v431_v44 = vsel %vm421_vm1, nan, %v430_v42  ;;  %v328_v50 = vsel %vm327_vm2, 0.0, %v326_v47 }
 0x137   : > { %543 = vrot.lane.b32.xlu0 %v541_v43, %s861_s9 }
 0x13b   : > { %433 = vrot.lane.b32.xlu0 %v431_v44, %s861_s9 }
 0x1a9   : > { %v544_v49 = vpop.permute.xlu0 %543 }
 0x1aa   : > { %v546_v51 = vmul.f32 %v544_v49, %v328_v50 }
 0x1ac   : > { %v547_v52 = vpack.c.bf16 %v546_v51, %v546_v51 }
 0x1ad   : > { %v434_v53 = vpop.permute.xlu0 %433 }
 0x1ae   : > { %553 = vrot.lane.b32.xlu1 %v547_v52, %s863_s10  ;;  %v436_v54 = vmul.f32 %v434_v53, %v328_v50 }
 0x1b0   : > { %v437_v55 = vpack.c.bf16 %v436_v54, %v436_v54 }
 0x1b2   : > { %548 = vrot.lane.b32.xlu1 %v431_v44, %s864_s11 }
 0x220   : > { %v554_v6 = vpop.permute.xlu1 %553 }
 0x221   : > { %v558_v56 = vsel %vm555_vm3, %v437_v55, %v554_v6 }
 0x222   : > { %774 = vmatmul.mubr.msk.bf16.vlgmr.msra.gmra.mrb[0].mxu1 %vm580_vm4, %v558_v56 }
 0x224   : > { %v549_v57 = vpop.permute.xlu1 %548 }
 0x225   : > { %v551_v58 = vmul.f32 %v549_v57, %v328_v50 }
 0x227   : > { %564 = vperm.xlu0 %819, %v551_v58  }
 0x2a6   : > { %v565_v60 = vpop.permute.xlu0 %564 }
 0x2a7   : > { %v573_v61 = vmul.f32 %v752_v59, %v565_v60 }
 0x2f5   : > { %v617_v62 = vpop.f32.mrb[0].mxu1 }
 0x2f6   : > { %v618_v63 = vadd.f32 %v617_v62, %v573_v61  ;;  %v775_v0 = vpop.f32.mrb[1].mxu1 }
 0x2f7   : > { %v620_v2 = vpop.f32.mrb[2].mxu1 }
 0x2f8   : > { %624 = vst.msk [vmem:[%s254_s15] sm:$0xff] %vm623_vm6, %v618_v63  ;;  %641 = vrot.lane.b32.xlu0 %v618_v63, %s865_s18  ;;  %629 = vrot.lane.b32.xlu1 %v618_v63, %s866_s22  ;;  %v776_v3 = vpop.f32.mrb[3].mxu1 }
 0x2fc   : > { %635 = vrot.lane.b32.xlu1 %v618_v63, %s861_s9 }
 0x2ff   : > { %v627_v4 = vld [vmem:[%s254_s15 + $0x1] sm:$0xff] }
 0x36a   : > { %v630_v1 = vpop.permute.xlu1 %629  ;;  %v642_v10 = vpop.permute.xlu0 %641 }
 0x36b   : > { %v632_v5 = vadd.f32 %v630_v1, %v627_v4 }
 0x36d   : > { %633 = vst.msk [vmem:[%s254_s15 + $0x1] sm:$0xff] %vm623_vm6, %v632_v5 }
 0x36e   : > { %v636_v7 = vpop.permute.xlu1 %635 }
 0x374   : > { %v634_v8 = vld [vmem:[%s254_s15 + $0x2] sm:$0xff] }
 0x375   : > { %v638_v9 = vadd.f32 %v636_v7, %v634_v8 }
 0x377   : > { %639 = vst.msk [vmem:[%s254_s15 + $0x2] sm:$0xff] %vm623_vm6, %v638_v9 }
 0x37e   : > { %v640_v11 = vld [vmem:[%s254_s15 + $0x3] sm:$0xff] }
 0x37f   : > { %v644_v12 = vadd.f32 %v642_v10, %v640_v11 }
 0x381   : > { %645 = vst.msk [vmem:[%s254_s15 + $0x3] sm:$0xff] %vm623_vm6, %v644_v12 }
 0x382 PF: > { %s15_s20 = sadd.s32 1, %s851_s20   ;;  %s990_s18 = smov %s847_s19 }
 0x383   : > { %p12_p5 = scmp.ge.s32.totalorder %s15_s20, 4   ;;  %s991_s19 = smov %s993_s21 }
 0x385   :  { %14 = sbr.rel (!%p12_p5) target bundleno = 2 (0x2), region = 70 }

</bundles_post_ra>
